<compile_context>
chip_gen: v5e
topology: v5e:2x2
jax: 0.10.0
libtpu: 0.0.40
codegen_flags: <defaults>
</compile_context>

<pallas_src>
import functools
import math

import jax
import jax.numpy as jnp
import numpy as np
from jax.experimental import pallas as pl
from jax.experimental.pallas import tpu as pltpu


def _rup(v, m):
    return ((v + m - 1) // m) * m


_VMEM_LIMIT = 32 * 1024 * 1024          # explicit raise (v5e default 16 MiB), <= v7x budget
_BLOCK_BYTES_BUDGET = 6 * 1024 * 1024   # per-grid-step block budget (x2 when double-buffered)


# ----------------------------- Pallas kernels ------------------------------ #

def _conv_pool_kernel(p_ref, w_ref, b_ref, o_ref):
    """Fused conv (patch matmul) + bias + ReLU + 2x2 max-pool.

    p_ref: [4, TM, Kp] bf16 patch rows, corner-major: row r of every corner
           slab belongs to the same pooled output position, so the pool is an
           elementwise max over 4 matmul results.
    w_ref: [Kp, OCp] bf16   b_ref: [1, OCp] f32   o_ref: [TM, OCp] bf16
    relu(max(.) + b) == max(relu(. + b)) since the bias is shared per lane.
    """
    w = w_ref[...]
    y = jnp.dot(p_ref[0], w, preferred_element_type=jnp.float32)
    y = jnp.maximum(y, jnp.dot(p_ref[1], w, preferred_element_type=jnp.float32))
    y = jnp.maximum(y, jnp.dot(p_ref[2], w, preferred_element_type=jnp.float32))
    y = jnp.maximum(y, jnp.dot(p_ref[3], w, preferred_element_type=jnp.float32))
    o_ref[...] = jnp.maximum(y + b_ref[...], 0.0).astype(o_ref.dtype)


def _conv_kernel(p_ref, w_ref, b_ref, o_ref):
    """relu(patches @ w + b), no pooling.  p_ref: [TM, Kp]."""
    y = jnp.dot(p_ref[...], w_ref[...], preferred_element_type=jnp.float32)
    o_ref[...] = jnp.maximum(y + b_ref[...], 0.0).astype(o_ref.dtype)


def _fused_mlp_kernel(*refs, n_layers):
    """x -> [dot + bias (+ relu)] * n_layers; relu on all but the last layer.

    refs = (x_ref, w1, b1, ..., wn, bn, o_ref).  MXU inputs bf16, f32 epilogues.
    """
    x_ref, o_ref = refs[0], refs[-1]
    h = x_ref[...]
    for layer in range(n_layers):
        w_ref = refs[1 + 2 * layer]
        b_ref = refs[2 + 2 * layer]
        y = jnp.dot(h.astype(w_ref.dtype), w_ref[...],
                    preferred_element_type=jnp.float32) + b_ref[...]
        h = jnp.maximum(y, 0.0) if layer < n_layers - 1 else y
    o_ref[...] = h.astype(o_ref.dtype)


# ---------------------------- pallas_call wrappers -------------------------- #

def _conv_call(patches, w_mat, b_row, tm, *, pool):
    """Run one conv stage over row-blocked patches.

    pool=True : patches [4, Mtot, Kp] (corner-major), output [Mtot, OCp].
    pool=False: patches [Mtot, Kp],                   output [Mtot, OCp].
    """
    OCp = w_mat.shape[1]
    if pool:
        _, Mtot, Kp = patches.shape
        n_dots = 4
        p_spec = pl.BlockSpec((4, tm, Kp), lambda i: (0, i, 0))
        kern = _conv_pool_kernel
    else:
        Mtot, Kp = patches.shape
        n_dots = 1
        p_spec = pl.BlockSpec((tm, Kp), lambda i: (i, 0))
        kern = _conv_kernel
    flops = 2 * n_dots * Mtot * Kp * OCp
    bytes_accessed = int(patches.size * 2 + w_mat.size * 2 + b_row.size * 4
                         + Mtot * OCp * 2)
    return pl.pallas_call(
        kern,
        out_shape=jax.ShapeDtypeStruct((Mtot, OCp), jnp.bfloat16),
        grid_spec=pltpu.PrefetchScalarGridSpec(
            num_scalar_prefetch=0,
            grid=(Mtot // tm,),
            in_specs=[p_spec,
                      pl.BlockSpec((Kp, OCp), lambda i: (0, 0)),
                      pl.BlockSpec((1, OCp), lambda i: (0, 0))],
            out_specs=pl.BlockSpec((tm, OCp), lambda i: (i, 0)),
        ),
        compiler_params=pltpu.CompilerParams(
            dimension_semantics=("parallel",),
            vmem_limit_bytes=_VMEM_LIMIT),
        cost_estimate=pl.CostEstimate(flops=flops, transcendentals=0,
                                      bytes_accessed=bytes_accessed),
    )(patches, w_mat, b_row)


def _fused_head_call(x_pad, layers, tm):
    """Fused MLP head: relu on all layers but the last.  layers = [(w, b), ...]."""
    Mp, Dp = x_pad.shape
    Ap = layers[-1][0].shape[1]
    in_specs = [pl.BlockSpec((tm, Dp), lambda i: (i, 0))]
    args = [x_pad]
    flops = 0
    bytes_accessed = x_pad.size * 2 + Mp * Ap * 4
    for w, b in layers:
        Kd, Nd = w.shape
        in_specs.append(pl.BlockSpec((Kd, Nd), lambda i: (0, 0)))
        in_specs.append(pl.BlockSpec((1, Nd), lambda i: (0, 0)))
        args.extend([w, b])
        flops += 2 * Mp * Kd * Nd
        bytes_accessed += w.size * 2 + b.size * 4
    kern = functools.partial(_fused_mlp_kernel, n_layers=len(layers))
    return pl.pallas_call(
        kern,
        out_shape=jax.ShapeDtypeStruct((Mp, Ap), jnp.float32),
        grid_spec=pltpu.PrefetchScalarGridSpec(
            num_scalar_prefetch=0,
            grid=(Mp // tm,),
            in_specs=in_specs,
            out_specs=pl.BlockSpec((tm, Ap), lambda i: (i, 0)),
        ),
        compiler_params=pltpu.CompilerParams(
            dimension_semantics=("parallel",),
            vmem_limit_bytes=_VMEM_LIMIT),
        cost_estimate=pl.CostEstimate(flops=int(flops), transcendentals=0,
                                      bytes_accessed=int(bytes_accessed)),
    )(*args)


# ------------------------------- JAX glue ---------------------------------- #

def _extract_patches(x_nhwc, k):
    # [B, H, W, C] -> [B, OH, OW, C*k*k]; feature order (c, ky, kx), i.e. the
    # flatten order of a PyTorch [OC, C, k, k] conv weight.
    return jax.lax.conv_general_dilated_patches(
        x_nhwc, filter_shape=(k, k), window_strides=(1, 1), padding='VALID',
        dimension_numbers=('NHWC', 'HWIO', 'NHWC'))


def _pick_images_per_step(B, per_image_block_bytes):
    ib = max(1, _BLOCK_BYTES_BUDGET // max(1, per_image_block_bytes))
    if B >= 2:
        ib = min(ib, max(1, B // 2))   # keep >= 2 grid steps (v7x: 2 TensorCores)
    return max(1, min(ib, B))


def _conv_relu_pool(x_nhwc, w_mat, b_row, oc, *, pool, k=5, raw_out=False):
    """One conv stage (IB images per grid step).

    Returns the NHWC bf16 activation, or (rows=[Bp*Gp, OCp], Bp, Gp) when
    raw_out=True so the fused head can consume the padded rows directly.
    """
    B = x_nhwc.shape[0]
    p = _extract_patches(x_nhwc, k)                      # [B, OH, OW, K]
    _, OH, OW, K = p.shape
    Kp, OCp = w_mat.shape
    if pool:
        OH2, OW2 = OH // 2, OW // 2
        G = OH2 * OW2
        Gp = _rup(G, 8)
        IB = _pick_images_per_step(B, (4 * Gp * Kp + Gp * OCp) * 2)
        Bp = _rup(B, IB)
        # Regroup patch rows corner-major; in-kernel pool = max of 4 matmuls.
        p = p[:, :OH2 * 2, :OW2 * 2, :]
        p = p.reshape(B, OH2, 2, OW2, 2, K).transpose(2, 4, 0, 1, 3, 5)
        p = p.reshape(4, B, G, K)
        p = jnp.pad(p, ((0, 0), (0, Bp - B), (0, Gp - G), (0, Kp - K)))
        p = p.reshape(4, Bp * Gp, Kp)
        y = _conv_call(p, w_mat, b_row, IB * Gp, pool=True)   # [Bp*Gp, OCp]
        if raw_out:
            return y, Bp, Gp
        y = y.reshape(Bp, Gp, OCp)[:B, :G, :oc]
        return y.reshape(B, OH2, OW2, oc)                     # NHWC, bf16
    else:
        G = OH * OW
        Gp = _rup(G, 8)
        IB = _pick_images_per_step(B, (Gp * Kp + Gp * OCp) * 2)
        Bp = _rup(B, IB)
        p = p.reshape(B, G, K)
        p = jnp.pad(p, ((0, Bp - B), (0, Gp - G), (0, Kp - K)))
        p = p.reshape(Bp * Gp, Kp)
        y = _conv_call(p, w_mat, b_row, IB * Gp, pool=False)
        y = y.reshape(Bp, Gp, OCp)[:B, :G, :oc]
        return y.reshape(B, OH, OW, oc)                       # NHWC, bf16


# ------------------------- parameter init / packing ------------------------ #

def _uniform(key, shape, bound):
    return jax.random.uniform(key, shape, jnp.float32, -bound, bound)


def init_linear(key, fan_in, fan_out):
    kw, kb = jax.random.split(key)
    bound = 1.0 / math.sqrt(fan_in)
    return _uniform(kw, (fan_in, fan_out), bound), _uniform(kb, (fan_out,), bound)


def init_conv(key, oc, ic, k):
    kw, kb = jax.random.split(key)
    bound = 1.0 / math.sqrt(ic * k * k)
    return _uniform(kw, (oc, ic, k, k), bound), _uniform(kb, (oc,), bound)


def _pack_conv(w_oikk, b):
    oc, ic, k, _ = w_oikk.shape
    K = ic * k * k
    Kp, OCp = _rup(K, 128), _rup(oc, 128)
    w_mat = jnp.zeros((Kp, OCp), jnp.float32)
    w_mat = w_mat.at[:K, :oc].set(w_oikk.reshape(oc, K).T).astype(jnp.bfloat16)
    b_row = jnp.zeros((1, OCp), jnp.float32).at[0, :oc].set(b)
    return w_mat, b_row


def _pack_linear(w_io, b):
    fi, fo = w_io.shape
    Dp, Np = _rup(fi, 128), _rup(fo, 128)
    w_p = jnp.zeros((Dp, Np), jnp.float32).at[:fi, :fo].set(w_io).astype(jnp.bfloat16)
    b_p = jnp.zeros((1, Np), jnp.float32).at[0, :fo].set(b)
    return w_p, b_p


def _pack_conv3_as_head_layer(w_oikk, b, Gp_in, OCp_in):
    """conv3 with a single output position == a linear over the conv2-pooled
    map.  Row index = g*OCp_in + c with g = ky*k + kx, matching the flattened
    [Bp, Gp_in*OCp_in] conv2-stage output fed to the fused head.  Rows for
    padded spatial positions / padded channel lanes stay zero, which nullifies
    the garbage in the conv2 output's padded rows."""
    oc, ic, k, _ = w_oikk.shape
    OCp = _rup(oc, 128)
    w = jnp.zeros((Gp_in, OCp_in, OCp), jnp.float32)
    wt = jnp.transpose(w_oikk, (2, 3, 1, 0)).reshape(k * k, ic, oc)  # (ky,kx,c,oc)
    w = w.at[:k * k, :ic, :oc].set(wt)
    w = w.reshape(Gp_in * OCp_in, OCp).astype(jnp.bfloat16)
    b_row = jnp.zeros((1, OCp), jnp.float32).at[0, :oc].set(b)
    return w, b_row


# ------------------------------- the module -------------------------------- #

class DeepQNetworkPallas:
    """Forward-pass-only JAX/Pallas port of DeepQNetwork."""

    def __init__(self, key, input_dims, n_actions, fc1_dims, fc2_dims,
                 need_CNN=False):
        self.input_dims = input_dims
        self.fc1_dims = fc1_dims
        self.fc2_dims = fc2_dims
        self.n_actions = n_actions
        self.need_CNN = need_CNN
        self.fuse_conv3 = False
        self._raw = {}

        keys = jax.random.split(key, 7)
        if need_CNN:
            c = input_dims[0]
            cw1, cb1 = init_conv(keys[0], 15, c, 5)
            cw2, cb2 = init_conv(keys[1], 30, 15, 5)
            cw3, cb3 = init_conv(keys[2], 5, 30, 5)
            self.conv1 = _pack_conv(cw1, cb1)
            self.conv2 = _pack_conv(cw2, cb2)
            self._raw.update(conv1=(cw1, cb1), conv2=(cw2, cb2), conv3=(cw3, cb3))
            # Actual post-conv/pool spatial dims (floor pooling, like F.max_pool2d).
            h1, w1 = (input_dims[1] - 4) // 2, (input_dims[2] - 4) // 2
            h2, w2 = (h1 - 4) // 2, (w1 - 4) // 2
            self.fin_h, self.fin_w = h2 - 4, w2 - 4
            flat = self.fin_h * self.fin_w * 5
            self.dimsFromCNN = self.find_dims_from_cnn(input_dims)
            # NOTE: the original float formula can disagree with the true
            # flatten size for odd spatial dims; fcCNN is built for the true
            # size so the forward pass stays well-defined.
            wc, bc = init_linear(keys[3], flat, fc1_dims)
            w2f, b2f = init_linear(keys[4], fc1_dims, fc2_dims)
            w3f, b3f = init_linear(keys[5], fc2_dims, n_actions)
            self._raw.update(fc_first=(wc, bc), fc2=(w2f, b2f), fc3=(w3f, b3f))

            self.G2p = _rup(h2 * w2, 8)              # conv2-pooled rows (padded)
            self.OC2p = self.conv2[0].shape[1]       # conv2 lanes (128)
            self.fuse_conv3 = (self.fin_h == 1 and self.fin_w == 1)
            if self.fuse_conv3:
                # conv3 is a single-position linear -> fuse into one 4-matmul
                # head (conv3 -> fcCNN -> fc2 -> fc3) fed by conv2's raw rows.
                # Flatten of [5,1,1] is channel order, so fcCNN needs no permute.
                conv3_layer = _pack_conv3_as_head_layer(cw3, cb3, self.G2p, self.OC2p)
                self.head_in = self.G2p * self.OC2p
                self.head_layers = [conv3_layer, _pack_linear(wc, bc),
                                    _pack_linear(w2f, b2f), _pack_linear(w3f, b3f)]
            else:
                # TODO(synk): fin_h/fin_w > 1 keeps conv3 as its own stage; the
                # Toeplitz-matmul fusion is only built for the 1x1 case.
                self.conv3 = _pack_conv(cw3, cb3)
                # PyTorch flattens NCHW -> (c, h, w); our activations flatten
                # as (h, w, c): permute fcCNN's input rows once here.
                wc_hwc = wc.reshape(5, self.fin_h, self.fin_w, fc1_dims)
                wc_hwc = wc_hwc.transpose(1, 2, 0, 3).reshape(flat, fc1_dims)
                self.head_in = flat
                self.head_layers = [_pack_linear(wc_hwc, bc),
                                    _pack_linear(w2f, b2f), _pack_linear(w3f, b3f)]
        else:
            w1, b1 = init_linear(keys[3], input_dims[0], fc1_dims)
            w2f, b2f = init_linear(keys[4], fc1_dims, fc2_dims)
            w3f, b3f = init_linear(keys[5], fc2_dims, n_actions)
            self._raw.update(fc_first=(w1, b1), fc2=(w2f, b2f), fc3=(w3f, b3f))
            self.dimsFromCNN = self.find_dims_from_cnn(input_dims)
            self.head_in = input_dims[0]
            self.head_layers = [_pack_linear(w1, b1), _pack_linear(w2f, b2f),
                                _pack_linear(w3f, b3f)]

        self._jit_forward = jax.jit(self._forward)

    def find_dims_from_cnn(self, image_shape):
        if not self.need_CNN:
            return 42
        h = image_shape[1] - 5 + 1
        h = (h - 2) / 2 + 1
        h = h - 5 + 1
        h = (h - 2) / 2 + 1
        fin_h = h - 5 + 1
        w = image_shape[2] - 5 + 1
        w = (w - 2) / 2 + 1
        w = w - 5 + 1
        w = (w - 2) / 2 + 1
        fin_w = w - 5 + 1
        return int(fin_h * fin_w * 5)

    @staticmethod
    def _choose_tm(B, row_bytes):
        # tm rounded to 16 (bf16 sublane packing); grow for big B but keep the
        # double-buffered x tile inside the per-step block budget.
        cap = max(16, (_BLOCK_BYTES_BUDGET // max(1, 2 * row_bytes)) // 16 * 16)
        tm = min(_rup(B, 16), 512, cap)
        return tm, _rup(B, tm)

    def _head_exact(self, feats):
        # feats: [B, head_in] exact features -> lane/sublane-dense padded slab.
        B = feats.shape[0]
        Dp = self.head_layers[0][0].shape[0]
        tm, Mp = self._choose_tm(B, Dp * 2)
        x = jnp.zeros((Mp, Dp), jnp.bfloat16)
        x = x.at[:B, :self.head_in].set(feats.astype(jnp.bfloat16))
        q = _fused_head_call(x, self.head_layers, tm)
        return q[:B, :self.n_actions]

    def _head_fused_cnn(self, conv2_rows, Bp, B):
        # conv2_rows: [Bp*G2p, OC2p] raw conv2-stage output.  The reshape is a
        # contiguous no-op; padded rows/lanes are nullified by zero weight rows
        # and padded batch rows only produce garbage Q rows that get sliced off.
        D = self.G2p * self.OC2p
        feats = conv2_rows.reshape(Bp, D)
        tm, Mp = self._choose_tm(B, D * 2)
        if Mp <= Bp:
            x = feats[:Mp]
        else:
            x = jnp.pad(feats, ((0, Mp - Bp), (0, 0)))
        q = _fused_head_call(x, self.head_layers, tm)
        return q[:B, :self.n_actions]

    def _forward(self, x):
        if self.need_CNN:
            B = x.shape[0]
            a = x.transpose(0, 2, 3, 1).astype(jnp.bfloat16)   # NCHW -> NHWC once
            a = _conv_relu_pool(a, *self.conv1, 15, pool=True)
            if self.fuse_conv3:
                rows, Bp, _ = _conv_relu_pool(a, *self.conv2, 30, pool=True,
                                              raw_out=True)
                return self._head_fused_cnn(rows, Bp, B)
            a = _conv_relu_pool(a, *self.conv2, 30, pool=True)
            a = _conv_relu_pool(a, *self.conv3, 5, pool=False)
            feats = a.reshape(B, -1)                            # (h, w, c) flatten
            return self._head_exact(feats)
        return self._head_exact(x)

    def forward(self, x):
        return self._jit_forward(x)


# ------------------------------ pure-JAX reference -------------------------- #

def _reference_forward(net, x):
    """f32 reference implementing the original PyTorch forward."""
    r = net._raw
    if net.need_CNN:
        def conv(a, w, b):
            y = jax.lax.conv_general_dilated(
                a, w, window_strides=(1, 1), padding='VALID',
                dimension_numbers=('NCHW', 'OIHW', 'NCHW'))
            return jax.nn.relu(y + b[None, :, None, None])

        def pool(a):
            B, C, H, W = a.shape
            a = a[:, :, :H // 2 * 2, :W // 2 * 2]
            return a.reshape(B, C, H // 2, 2, W // 2, 2).max(axis=(3, 5))

        a = pool(conv(x, *r['conv1']))
        a = pool(conv(a, *r['conv2']))
        a = conv(a, *r['conv3'])
        h = a.reshape(a.shape[0], -1)                # NCHW flatten
    else:
        h = x
    w1, b1 = r['fc_first']
    h = jax.nn.relu(h @ w1 + b1)
    w2, b2 = r['fc2']
    h = jax.nn.relu(h @ w2 + b2)
    w3, b3 = r['fc3']
    return h @ w3 + b3


# --------------------------------- main ------------------------------------ #

if __name__ == "__main__":
    key = jax.random.PRNGKey(0)
    k_in1, k_in2, k_p1, k_p2 = jax.random.split(key, 4)

    # need_CNN=False branch: plain 3-layer MLP Q-head (one fused kernel).
    net_mlp = DeepQNetworkPallas(k_p1, input_dims=(8,), n_actions=6,
                                 fc1_dims=32, fc2_dims=32, need_CNN=False)
    x_mlp = jax.random.normal(k_in1, (4, 8), jnp.float32)
    out_mlp = jax.block_until_ready(net_mlp.forward(x_mlp))
    assert out_mlp.shape == (4, 6) and out_mlp.dtype == jnp.float32
    np.testing.assert_allclose(np.asarray(out_mlp),
                               np.asarray(_reference_forward(net_mlp, x_mlp)),
                               rtol=0.15, atol=0.15)

    # need_CNN=True branch: NCHW input; 32x32 -> 1x1x5 final map, so conv3 is
    # fused into the head (two conv+pool kernels + one 4-matmul head kernel).
    net_cnn = DeepQNetworkPallas(k_p2, input_dims=(4, 32, 32), n_actions=6,
                                 fc1_dims=32, fc2_dims=32, need_CNN=True)
    x_cnn = jax.random.normal(k_in2, (2, 4, 32, 32), jnp.float32)
    out_cnn = jax.block_until_ready(net_cnn.forward(x_cnn))
    assert out_cnn.shape == (2, 6) and out_cnn.dtype == jnp.float32
    np.testing.assert_allclose(np.asarray(out_cnn),
                               np.asarray(_reference_forward(net_cnn, x_cnn)),
                               rtol=0.15, atol=0.15)

    print("KERNEL_OK")
</pallas_src>

<mosaic_0001>
module attributes {stable_mosaic.version = 11 : i64} {
  func.func @_fused_mlp_kernel(%arg0: i32, %arg1: memref<16x128xbf16, #tpu.memory_space<vmem>>, %arg2: memref<128x128xbf16, #tpu.memory_space<vmem>>, %arg3: memref<1x128xf32, #tpu.memory_space<vmem>>, %arg4: memref<128x128xbf16, #tpu.memory_space<vmem>>, %arg5: memref<1x128xf32, #tpu.memory_space<vmem>>, %arg6: memref<128x128xbf16, #tpu.memory_space<vmem>>, %arg7: memref<1x128xf32, #tpu.memory_space<vmem>>, %arg8: memref<16x128xf32, #tpu.memory_space<vmem>>) attributes {dimension_semantics = [#tpu.dimension_semantics<parallel>], iteration_bounds = array<i64: 1>, scalar_prefetch = 0 : i64, scratch_operands = 0 : i64, tpu.core_type = #tpu.core_type<tc>, window_params = [{transform_indices = @transform_0, window_bounds = array<i64: 16, 128>}, {pipeline_mode = #tpu.pipeline_mode<synchronous>, transform_indices = @transform_1, window_bounds = array<i64: 128, 128>}, {pipeline_mode = #tpu.pipeline_mode<synchronous>, transform_indices = @transform_2, window_bounds = array<i64: 1, 128>}, {pipeline_mode = #tpu.pipeline_mode<synchronous>, transform_indices = @transform_3, window_bounds = array<i64: 128, 128>}, {pipeline_mode = #tpu.pipeline_mode<synchronous>, transform_indices = @transform_4, window_bounds = array<i64: 1, 128>}, {pipeline_mode = #tpu.pipeline_mode<synchronous>, transform_indices = @transform_5, window_bounds = array<i64: 128, 128>}, {pipeline_mode = #tpu.pipeline_mode<synchronous>, transform_indices = @transform_6, window_bounds = array<i64: 1, 128>}, {transform_indices = @transform_7, window_bounds = array<i64: 16, 128>}]} {
    %c0 = arith.constant 0 : index
    %c0_0 = arith.constant 0 : index
    %0 = vector.load %arg1[%c0, %c0_0] : memref<16x128xbf16, #tpu.memory_space<vmem>>, vector<16x128xbf16>
    %c0_1 = arith.constant 0 : index
    %c0_2 = arith.constant 0 : index
    %1 = vector.load %arg2[%c0_1, %c0_2] : memref<128x128xbf16, #tpu.memory_space<vmem>>, vector<128x128xbf16>
    %cst = arith.constant dense<0.000000e+00> : vector<16x128xf32>
    %2 = tpu.matmul %0, %1, %cst {dimension_numbers = #tpu.dot_dimension_numbers<[1], [0], [0], [1], [0, 0, 1, 1], [], []>} : vector<16x128xbf16>, vector<128x128xbf16>, vector<16x128xf32> -> vector<16x128xf32>
    %c0_3 = arith.constant 0 : index
    %c0_4 = arith.constant 0 : index
    %3 = vector.load %arg3[%c0_3, %c0_4] : memref<1x128xf32, #tpu.memory_space<vmem>>, vector<1x128xf32>
    %4 = vector.broadcast %3 : vector<1x128xf32> to vector<16x128xf32>
    %5 = arith.addf %2, %4 : vector<16x128xf32>
    %cst_5 = arith.constant 0.000000e+00 : f32
    %6 = vector.broadcast %cst_5 : f32 to vector<16x128xf32>
    %7 = arith.maximumf %5, %6 : vector<16x128xf32>
    %8 = arith.truncf %7 : vector<16x128xf32> to vector<16x128xbf16>
    %c0_6 = arith.constant 0 : index
    %c0_7 = arith.constant 0 : index
    %9 = vector.load %arg4[%c0_6, %c0_7] : memref<128x128xbf16, #tpu.memory_space<vmem>>, vector<128x128xbf16>
    %cst_8 = arith.constant dense<0.000000e+00> : vector<16x128xf32>
    %10 = tpu.matmul %8, %9, %cst_8 {dimension_numbers = #tpu.dot_dimension_numbers<[1], [0], [0], [1], [0, 0, 1, 1], [], []>} : vector<16x128xbf16>, vector<128x128xbf16>, vector<16x128xf32> -> vector<16x128xf32>
    %c0_9 = arith.constant 0 : index
    %c0_10 = arith.constant 0 : index
    %11 = vector.load %arg5[%c0_9, %c0_10] : memref<1x128xf32, #tpu.memory_space<vmem>>, vector<1x128xf32>
    %12 = vector.broadcast %11 : vector<1x128xf32> to vector<16x128xf32>
    %13 = arith.addf %10, %12 : vector<16x128xf32>
    %cst_11 = arith.constant 0.000000e+00 : f32
    %14 = vector.broadcast %cst_11 : f32 to vector<16x128xf32>
    %15 = arith.maximumf %13, %14 : vector<16x128xf32>
    %16 = arith.truncf %15 : vector<16x128xf32> to vector<16x128xbf16>
    %c0_12 = arith.constant 0 : index
    %c0_13 = arith.constant 0 : index
    %17 = vector.load %arg6[%c0_12, %c0_13] : memref<128x128xbf16, #tpu.memory_space<vmem>>, vector<128x128xbf16>
    %cst_14 = arith.constant dense<0.000000e+00> : vector<16x128xf32>
    %18 = tpu.matmul %16, %17, %cst_14 {dimension_numbers = #tpu.dot_dimension_numbers<[1], [0], [0], [1], [0, 0, 1, 1], [], []>} : vector<16x128xbf16>, vector<128x128xbf16>, vector<16x128xf32> -> vector<16x128xf32>
    %c0_15 = arith.constant 0 : index
    %c0_16 = arith.constant 0 : index
    %19 = vector.load %arg7[%c0_15, %c0_16] : memref<1x128xf32, #tpu.memory_space<vmem>>, vector<1x128xf32>
    %20 = vector.broadcast %19 : vector<1x128xf32> to vector<16x128xf32>
    %21 = arith.addf %18, %20 : vector<16x128xf32>
    %c0_17 = arith.constant 0 : index
    %c0_18 = arith.constant 0 : index
    %22 = vector.load %arg8[%c0_17, %c0_18] : memref<16x128xf32, #tpu.memory_space<vmem>>, vector<16x128xf32>
    tpu.vector_store %arg8[%c0_17, %c0_18], %21 {strides = array<i32>} : memref<16x128xf32, #tpu.memory_space<vmem>>, vector<16x128xf32>,
    return
  }
  func.func @transform_0(%arg0: i32) -> (i32, i32) {
    %c0_i32 = arith.constant 0 : i32
    %c0_i32_0 = arith.constant 0 : i32
    return %arg0, %c0_i32 : i32, i32
  }
  func.func @transform_1(%arg0: i32) -> (i32, i32) {
    %c0_i32 = arith.constant 0 : i32
    %c0_i32_0 = arith.constant 0 : i32
    %c0_i32_1 = arith.constant 0 : i32
    return %c0_i32, %c0_i32_0 : i32, i32
  }
  func.func @transform_2(%arg0: i32) -> (i32, i32) {
    %c0_i32 = arith.constant 0 : i32
    %c0_i32_0 = arith.constant 0 : i32
    %c0_i32_1 = arith.constant 0 : i32
    return %c0_i32, %c0_i32_0 : i32, i32
  }
  func.func @transform_3(%arg0: i32) -> (i32, i32) {
    %c0_i32 = arith.constant 0 : i32
    %c0_i32_0 = arith.constant 0 : i32
    %c0_i32_1 = arith.constant 0 : i32
    return %c0_i32, %c0_i32_0 : i32, i32
  }
  func.func @transform_4(%arg0: i32) -> (i32, i32) {
    %c0_i32 = arith.constant 0 : i32
    %c0_i32_0 = arith.constant 0 : i32
    %c0_i32_1 = arith.constant 0 : i32
    return %c0_i32, %c0_i32_0 : i32, i32
  }
  func.func @transform_5(%arg0: i32) -> (i32, i32) {
    %c0_i32 = arith.constant 0 : i32
    %c0_i32_0 = arith.constant 0 : i32
    %c0_i32_1 = arith.constant 0 : i32
    return %c0_i32, %c0_i32_0 : i32, i32
  }
  func.func @transform_6(%arg0: i32) -> (i32, i32) {
    %c0_i32 = arith.constant 0 : i32
    %c0_i32_0 = arith.constant 0 : i32
    %c0_i32_1 = arith.constant 0 : i32
    return %c0_i32, %c0_i32_0 : i32, i32
  }
  func.func @transform_7(%arg0: i32) -> (i32, i32) {
    %c0_i32 = arith.constant 0 : i32
    %c0_i32_0 = arith.constant 0 : i32
    return %arg0, %c0_i32 : i32, i32
  }
}

</mosaic_0001>

<bundles_post_ra>
// kernel: _forward.1
= control target key start
LH: loop header
LB: loop body
LE: loop exit
PB: predicated region body
PF: predicated region fallthrough
CT: control target
= control target key end

     0   :  { %12 = vsyncpa [#allocation3], 0  ;;  %s622_s0 = inlined_call_operand.vmem [shape: bf16[16,128], index: 0, kind: input, shape index: {}]   ;;  %s623_s1 = inlined_call_operand.hbm [shape: bf16[128,128], index: 1, kind: input, shape index: {}]   ;;  %s624_s2 = inlined_call_operand.vmem [shape: f32[1,128], index: 2, kind: input, shape index: {}]   ;;  %s625_s3 = inlined_call_operand.hbm [shape: bf16[128,128], index: 3, kind: input, shape index: {}]   ;;  %s626_s4 = inlined_call_operand.vmem [shape: f32[1,128], index: 4, kind: input, shape index: {}]   ;;  %s627_s5 = inlined_call_operand.hbm [shape: bf16[128,128], index: 5, kind: input, shape index: {}]   ;;  %s628_s6 = inlined_call_operand.vmem [shape: f32[1,128], index: 6, kind: input, shape index: {}]   ;;  %s629_s7 = inlined_call_operand.vmem [shape: f32[16,128], index: 7, kind: output, shape index: {}]  }
   0x1   :  { %13 = vsyncpa [#allocation5], 0  ;;  %s35_s26 = sshll.u32 %s625_s3, 4  ;;  %s550_s27 = smov [#allocation4]   ;;  %s36_s26 = int_to_ptr.hbm [resolvable:$true] %s35_s26 }
   0x2   :  { %s37_s28 = sshll.u32 %s550_s27, 4  ;;  %s20_s8 = sshll.u32 %s623_s1, 4  ;;  %s38_s28 = int_to_ptr.vmem [resolvable:$true] %s37_s28  ;;  %s21_s8 = int_to_ptr.hbm [resolvable:$true] %s20_s8 }
   0x3   :  { %s551_s9 = smov 64   ;;  %s552_s10 = smov 4  }
   0x4   :  { %43 = dma.hbm_to_vmem [thread:$0]  %s36_s26, 1024, %s38_s28, [#allocation5], %s551_s9, %s551_s9, %s552_s10  }
   0x5   :  { %s553_s11 = smov [#allocation2]   ;;  %s50_s15 = sshll.u32 %s627_s5, 4  ;;  %s51_s15 = int_to_ptr.hbm [resolvable:$true] %s50_s15 }
   0x6   :  { %s22_s12 = sshll.u32 %s553_s11, 4  ;;  %s554_s3 = smov [#allocation6]   ;;  %s23_s12 = int_to_ptr.vmem [resolvable:$true] %s22_s12 }
   0x7   :  { %28 = dma.hbm_to_vmem [thread:$0]  %s21_s8, 1024, %s23_s12, [#allocation3], %s551_s9, %s551_s9, %s552_s10  }
   0x8   :  { %s52_s16 = sshll.u32 %s554_s3, 4  ;;  %s53_s16 = int_to_ptr.vmem [resolvable:$true] %s52_s16 }
   0x9   :  { %58 = dma.hbm_to_vmem [thread:$0]  %s51_s15, 1024, %s53_s16, [#allocation5], %s551_s9, %s551_s9, %s552_s10  }
   0xa   :  { %546 = dma.done.wait [#allocation3], 1024  }
   0xb   :  { %547 = vsyncadd [#allocation3], 4294966272 }
   0xc   :  { %548 = dma.done.wait [#allocation5], 2048  }
   0xd   :  { %549 = vsyncadd [#allocation5], 4294965248  ;;  %v449_v0 = vld [vmem:[#allocation2 + $0x38] sm:$0xff]  ;;  %v448_v1 = vld [vmem:[#allocation2 + $0x30] sm:$0xff] }
   0xe   :  { %149 = vmatpush.bf16.msra.mxu0 %v449_v0  ;;  %v457_v2 = vld [vmem:[#allocation4 + $0x38] sm:$0xff]  ;;  %v456_v3 = vld [vmem:[#allocation4 + $0x30] sm:$0xff]  ;;  %v447_v4 = vld [vmem:[#allocation2 + $0x28] sm:$0xff] }
   0xf   :  { %234 = vmatpush.bf16.msra.mxu1 %v457_v2  ;;  %v455_v5 = vld [vmem:[#allocation4 + $0x28] sm:$0xff]  ;;  %v446_v6 = vld [vmem:[#allocation2 + $0x20] sm:$0xff]  ;;  %v445_v8 = vld [vmem:[#allocation2 + $0x18] sm:$0xff] }
  0x10   :  { %v454_v7 = vld [vmem:[#allocation4 + $0x20] sm:$0xff]  ;;  %v444_v9 = vld [vmem:[#allocation2 + $0x10] sm:$0xff]  ;;  %v443_v10 = vld [vmem:[#allocation2 + $0x8] sm:$0xff] }
  0x11   :  { %v442_v11 = vld [vmem:[#allocation2] sm:$0xff]  ;;  %v453_v13 = vld [vmem:[#allocation4 + $0x18] sm:$0xff]  ;;  %v452_v14 = vld [vmem:[#allocation4 + $0x10] sm:$0xff] }
  0x12   :  { %150 = vmatpush.bf16.msra.mxu0 %v448_v1  ;;  %v441_v12 = vld [vmem:[%s622_s0] sm:$0xff]  ;;  %v451_v15 = vld [vmem:[#allocation4 + $0x8] sm:$0xff]  ;;  %v465_v17 = vld [vmem:[#allocation6 + $0x38] sm:$0xff] }
  0x13   :  { %235 = vmatpush.bf16.msra.mxu1 %v456_v3  ;;  %v450_v16 = vld [vmem:[#allocation4] sm:$0xff]  ;;  %319 = vmatpush.bf16.msra.mxu2 %v465_v17  ;;  %v464_v18 = vld [vmem:[#allocation6 + $0x30] sm:$0xff]  ;;  %v463_v19 = vld [vmem:[#allocation6 + $0x28] sm:$0xff] }
  0x14   :  { %v462_v20 = vld [vmem:[#allocation6 + $0x20] sm:$0xff]  ;;  %v461_v29 = vld [vmem:[#allocation6 + $0x18] sm:$0xff]  ;;  %v460_v30 = vld [vmem:[#allocation6 + $0x10] sm:$0xff] }
  0x15   :  { %v471_v22 = vld [vmem:[%s624_s2] ss:$0 sm:$0xff]  ;;  %v459_v31 = vld [vmem:[#allocation6 + $0x8] sm:$0xff] }
  0x16   :  { %151 = vmatpush.bf16.msra.mxu0 %v447_v4  ;;  %v458_v32 = vld [vmem:[#allocation6] sm:$0xff] }
  0x17   :  { %236 = vmatpush.bf16.msra.mxu1 %v455_v5  ;;  %320 = vmatpush.bf16.msra.mxu2 %v464_v18  ;;  %v472_v34 = vld [vmem:[%s626_s4] ss:$0 sm:$0xff] }
  0x18   :  { %v473_v41 = vld [vmem:[%s628_s6] ss:$0 sm:$0xff] }
  0x1a   :  { %152 = vmatpush.bf16.msra.mxu0 %v446_v6 }
  0x1b   :  { %237 = vmatpush.bf16.msra.mxu1 %v454_v7  ;;  %321 = vmatpush.bf16.msra.mxu2 %v463_v19 }
  0x1e   :  { %153 = vmatpush.bf16.msra.mxu0 %v445_v8 }
  0x1f   :  { %238 = vmatpush.bf16.msra.mxu1 %v453_v13  ;;  %322 = vmatpush.bf16.msra.mxu2 %v462_v20 }
  0x22   :  { %154 = vmatpush.bf16.msra.mxu0 %v444_v9 }
  0x23   :  { %239 = vmatpush.bf16.msra.mxu1 %v452_v14  ;;  %323 = vmatpush.bf16.msra.mxu2 %v461_v29 }
  0x26   :  { %155 = vmatpush.bf16.msra.mxu0 %v443_v10 }
  0x27   :  { %240 = vmatpush.bf16.msra.mxu1 %v451_v15  ;;  %324 = vmatpush.bf16.msra.mxu2 %v460_v30 }
  0x2a   :  { %156 = vmatpush.bf16.msra.mxu0 %v442_v11 }
  0x2b   :  { %241 = vmatpush.bf16.msra.mxu1 %v450_v16  ;;  %325 = vmatpush.bf16.msra.mxu2 %v459_v31 }
  0x2d   :  { %157 = vmatmul.bf16.vlgmr.msra.gmra.mxu0 %v441_v12 }
  0x2f   :  { %326 = vmatpush.bf16.msra.mxu2 %v458_v32 }
  0xaa   :  { %v158_v21 = vpop.f32.mrf.mxu0 }
  0xab   :  { %v159_v23 = vadd.f32 %v471_v22, %v158_v21 }
  0xad   :  { %v163_v26 = vmax.f32 %v159_v23, 0.0 }
  0xb2   :  { %v160_v24 = vpop.f32.mrf.mxu0 }
  0xb3   :  { %v161_v25 = vadd.f32 %v471_v22, %v160_v24 }
  0xb5   :  { %v164_v27 = vmax.f32 %v161_v25, 0.0 }
  0xb7   :  { %v165_v28 = vpack.c.bf16 %v164_v27, %v163_v26 }
  0xb9   :  { %242 = vmatmul.bf16.vlgmr.msra.gmra.mxu1 %v165_v28 }
 0x136   :  { %v243_v33 = vpop.f32.mrf.mxu1 }
 0x137   :  { %v244_v35 = vadd.f32 %v472_v34, %v243_v33 }
 0x139   :  { %v248_v38 = vmax.f32 %v244_v35, 0.0 }
 0x13e   :  { %v245_v36 = vpop.f32.mrf.mxu1 }
 0x13f   :  { %v246_v37 = vadd.f32 %v472_v34, %v245_v36 }
 0x141   :  { %v249_v39 = vmax.f32 %v246_v37, 0.0 }
 0x143   :  { %v250_v40 = vpack.c.bf16 %v249_v39, %v248_v38 }
 0x145   :  { %327 = vmatmul.bf16.vlgmr.msra.gmra.mxu2 %v250_v40 }
 0x1c8   :  { %v328_v42 = vpop.f32.mrf.mxu2 }
 0x1c9   :  { %v329_v43 = vadd.f32 %v473_v41, %v328_v42 }
 0x1cb   :  { %333 = vst [vmem:[%s629_s7] sm:$0xff] %v329_v43 }
 0x1d0   :  { %v330_v44 = vpop.f32.mrf.mxu2 }
 0x1d1   :  { %v331_v45 = vadd.f32 %v473_v41, %v330_v44 }
 0x1d3   :  { %334 = vst [vmem:[%s629_s7 + $0x8] sm:$0xff] %v331_v45 }
 0x1d4   :  { %339 = vsyncpa [#allocation3], 1 }
 0x1d5   :  { %340 = vsyncpa [#allocation5], 1 }

</bundles_post_ra>
